<compile_context>
chip_gen: v7x
topology: tpu7x:2x2x1
jax: 0.10.0
libtpu: 0.0.40
codegen_flags: <defaults>
</compile_context>

<pallas_src>
import jax
import jax.numpy as jnp
from jax.experimental import pallas as pl
from jax.experimental.pallas import tpu as pltpu

_LANE = 128


def _gru_step_kernel(x_ref, h_ref, wx_ref, wh_ref, b_ref, o_ref):
    """One fused GRU step.

    x_ref : (B, I)     f32
    h_ref : (B, H)     f32
    wx_ref: (I, 3*HP)  bf16  [W_ir | W_iz | W_in]^T, lane-padded per gate block
    wh_ref: (H, 3*HP)  bf16  [W_hr | W_hz | W_hn]^T, lane-padded per gate block
    b_ref : (2, 3*HP)  f32   row 0 -> x-projection bias, row 1 -> h-projection bias
    o_ref : (B, H)     f32   new hidden state
    """
    H = h_ref.shape[1]
    HP = wx_ref.shape[1] // 3

    h = h_ref[...]           # keep f32 copy for the z*h blend (full precision)
    b = b_ref[...]

    # Two accumulated MXU matmuls: bf16 operands, f32 accumulation.
    g1 = jnp.dot(x_ref[...].astype(wx_ref.dtype), wx_ref[...],
                 preferred_element_type=jnp.float32) + b[0:1, :]
    g2 = jnp.dot(h.astype(wh_ref.dtype), wh_ref[...],
                 preferred_element_type=jnp.float32) + b[1:2, :]

    # Gate slices all start on 128-lane boundaries (k * HP); math stays f32.
    r = jax.nn.sigmoid(g1[:, 0:H] + g2[:, 0:H])
    z = jax.nn.sigmoid(g1[:, HP:HP + H] + g2[:, HP:HP + H])
    n = jnp.tanh(g1[:, 2 * HP:2 * HP + H] + r * g2[:, 2 * HP:2 * HP + H])

    o_ref[...] = ((1.0 - z) * n + z * h).astype(o_ref.dtype)


def pack_gru_params(w_ih, w_hh, b_ih, b_hh):
    """Pack PyTorch-layout GRU params into the kernel's fused, lane-padded layout.

    w_ih: (3H, I), w_hh: (3H, H), b_ih / b_hh: (3H,)  (gate order r, z, n)
    Returns wx (I, 3*HP) bf16, wh (H, 3*HP) bf16, b (2, 3*HP) f32.
    """
    I = w_ih.shape[1]
    H = w_hh.shape[1]
    HP = ((H + _LANE - 1) // _LANE) * _LANE

    wi_t = w_ih.T.astype(jnp.float32)   # (I, 3H)
    wh_t = w_hh.T.astype(jnp.float32)   # (H, 3H)

    wx = jnp.zeros((I, 3 * HP), jnp.float32)
    wh = jnp.zeros((H, 3 * HP), jnp.float32)
    b = jnp.zeros((2, 3 * HP), jnp.float32)
    for g in range(3):                  # r, z, n gate blocks
        wx = wx.at[:, g * HP:g * HP + H].set(wi_t[:, g * H:(g + 1) * H])
        wh = wh.at[:, g * HP:g * HP + H].set(wh_t[:, g * H:(g + 1) * H])
    # r/z biases (b_ih + b_hh) and b_in ride with the x projection (row 0);
    # b_hn must stay with the h projection (row 1): n = tanh(.. + r*(W_hn h + b_hn)).
    b = b.at[0, 0:H].set(b_ih[0:H] + b_hh[0:H])
    b = b.at[0, HP:HP + H].set(b_ih[H:2 * H] + b_hh[H:2 * H])
    b = b.at[0, 2 * HP:2 * HP + H].set(b_ih[2 * H:3 * H])
    b = b.at[1, 2 * HP:2 * HP + H].set(b_hh[2 * H:3 * H])
    return wx.astype(jnp.bfloat16), wh.astype(jnp.bfloat16), b


def gru_rnn_forward(x, h, wx, wh, b):
    """Single GRU step: returns (y, h1) == (h', h'), each (batch, hidden), f32."""
    B, H = h.shape
    vmem = pl.BlockSpec(memory_space=pltpu.MemorySpace.VMEM)
    h_new = pl.pallas_call(
        _gru_step_kernel,
        out_shape=jax.ShapeDtypeStruct((B, H), jnp.float32),
        in_specs=[vmem, vmem, vmem, vmem, vmem],
        out_specs=vmem,
    )(x, h, wx, wh, b)
    # Module semantics: y.squeeze(1) == h1.squeeze(0) == new hidden state.
    return h_new, h_new


def init_gru_params(key, in_size, hidden_size, use_zero_bias_hh=True):
    """PyTorch nn.GRU default init: U(-1/sqrt(H), 1/sqrt(H)); b_hh zeroed if requested."""
    k = 1.0 / jnp.sqrt(jnp.float32(hidden_size))
    k_wih, k_whh, k_bih, k_bhh = jax.random.split(key, 4)
    w_ih = jax.random.uniform(k_wih, (3 * hidden_size, in_size), jnp.float32, -k, k)
    w_hh = jax.random.uniform(k_whh, (3 * hidden_size, hidden_size), jnp.float32, -k, k)
    b_ih = jax.random.uniform(k_bih, (3 * hidden_size,), jnp.float32, -k, k)
    if use_zero_bias_hh:
        b_hh = jnp.zeros((3 * hidden_size,), jnp.float32)
    else:
        b_hh = jax.random.uniform(k_bhh, (3 * hidden_size,), jnp.float32, -k, k)
    return w_ih, w_hh, b_ih, b_hh


def _gru_reference(x, h, w_ih, w_hh, b_ih, b_hh):
    """Pure-JAX f32 reference of the PyTorch GRU cell from the raw params."""
    H = w_hh.shape[1]
    gi = x @ w_ih.T + b_ih
    gh = h @ w_hh.T + b_hh
    r = jax.nn.sigmoid(gi[:, :H] + gh[:, :H])
    z = jax.nn.sigmoid(gi[:, H:2 * H] + gh[:, H:2 * H])
    n = jnp.tanh(gi[:, 2 * H:] + r * gh[:, 2 * H:])
    return (1.0 - z) * n + z * h


if __name__ == "__main__":
    in_size = 16
    hidden_size = 32
    batch = 8       # multiple of 8 sublanes

    key = jax.random.PRNGKey(0)
    k_x0, k_x1, k_p = jax.random.split(key, 3)

    x0 = jax.random.normal(k_x0, (batch, in_size), jnp.float32)
    x1 = jax.random.normal(k_x1, (batch, in_size), jnp.float32)
    h0 = jnp.zeros((batch, hidden_size), jnp.float32)   # make_h0 with state0=None

    w_ih, w_hh, b_ih, b_hh = init_gru_params(k_p, in_size, hidden_size,
                                             use_zero_bias_hh=True)
    wx, wh, b = pack_gru_params(w_ih, w_hh, b_ih, b_hh)

    run = jax.jit(gru_rnn_forward)

    # Step 1 from the zero initial state, step 2 with the carried state so the
    # hidden-projection path is exercised with nonzero h.
    y1, h1 = run(x0, h0, wx, wh, b)
    y2, h2 = run(x1, h1, wx, wh, b)
    jax.block_until_ready((y1, h1, y2, h2))

    h1_ref = _gru_reference(x0, h0, w_ih, w_hh, b_ih, b_hh)
    h2_ref = _gru_reference(x1, h1_ref, w_ih, w_hh, b_ih, b_hh)

    assert y1.shape == (batch, hidden_size) and h1.shape == (batch, hidden_size)
    # bf16 weights/operands on the MXU -> compare against the f32 reference loosely.
    assert jnp.allclose(y1, h1_ref, atol=2e-2), "step-1 output mismatch vs reference"
    assert jnp.allclose(h1, h1_ref, atol=2e-2), "step-1 state mismatch vs reference"
    assert jnp.allclose(y2, h2_ref, atol=2e-2), "step-2 output mismatch vs reference"
    assert jnp.allclose(h2, h2_ref, atol=2e-2), "step-2 state mismatch vs reference"

    print("KERNEL_OK")
</pallas_src>

<mosaic_0001>
module attributes {stable_mosaic.version = 11 : i64} {
  func.func @_gru_step_kernel(%arg0: memref<8x16xf32, #tpu.memory_space<vmem>>, %arg1: memref<8x32xf32, #tpu.memory_space<vmem>>, %arg2: memref<16x384xbf16, #tpu.memory_space<vmem>>, %arg3: memref<32x384xbf16, #tpu.memory_space<vmem>>, %arg4: memref<2x384xf32, #tpu.memory_space<vmem>>, %arg5: memref<8x32xf32, #tpu.memory_space<vmem>>) attributes {dimension_semantics = [], scalar_prefetch = 0 : i64, scratch_operands = 0 : i64, tpu.core_type = #tpu.core_type<tc>} {
    %c0 = arith.constant 0 : index
    %c0_0 = arith.constant 0 : index
    %0 = vector.load %arg1[%c0, %c0_0] : memref<8x32xf32, #tpu.memory_space<vmem>>, vector<8x32xf32>
    %c0_1 = arith.constant 0 : index
    %c0_2 = arith.constant 0 : index
    %1 = vector.load %arg4[%c0_1, %c0_2] : memref<2x384xf32, #tpu.memory_space<vmem>>, vector<2x384xf32>
    %c0_3 = arith.constant 0 : index
    %c0_4 = arith.constant 0 : index
    %2 = vector.load %arg0[%c0_3, %c0_4] : memref<8x16xf32, #tpu.memory_space<vmem>>, vector<8x16xf32>
    %3 = arith.truncf %2 : vector<8x16xf32> to vector<8x16xbf16>
    %c0_5 = arith.constant 0 : index
    %c0_6 = arith.constant 0 : index
    %4 = vector.load %arg2[%c0_5, %c0_6] : memref<16x384xbf16, #tpu.memory_space<vmem>>, vector<16x384xbf16>
    %cst = arith.constant dense<0.000000e+00> : vector<8x384xf32>
    %5 = tpu.matmul %3, %4, %cst {dimension_numbers = #tpu.dot_dimension_numbers<[1], [0], [0], [1], [0, 0, 1, 1], [], []>} : vector<8x16xbf16>, vector<16x384xbf16>, vector<8x384xf32> -> vector<8x384xf32>
    %6 = vector.extract_strided_slice %1 {offsets = [0, 0], sizes = [1, 384], strides = [1, 1]} : vector<2x384xf32> to vector<1x384xf32>
    %7 = vector.broadcast %6 : vector<1x384xf32> to vector<8x384xf32>
    %8 = arith.addf %5, %7 : vector<8x384xf32>
    %9 = arith.truncf %0 : vector<8x32xf32> to vector<8x32xbf16>
    %c0_7 = arith.constant 0 : index
    %c0_8 = arith.constant 0 : index
    %10 = vector.load %arg3[%c0_7, %c0_8] : memref<32x384xbf16, #tpu.memory_space<vmem>>, vector<32x384xbf16>
    %cst_9 = arith.constant dense<0.000000e+00> : vector<8x384xf32>
    %11 = tpu.matmul %9, %10, %cst_9 {dimension_numbers = #tpu.dot_dimension_numbers<[1], [0], [0], [1], [0, 0, 1, 1], [], []>} : vector<8x32xbf16>, vector<32x384xbf16>, vector<8x384xf32> -> vector<8x384xf32>
    %12 = vector.extract_strided_slice %1 {offsets = [1, 0], sizes = [1, 384], strides = [1, 1]} : vector<2x384xf32> to vector<1x384xf32>
    %13 = vector.broadcast %12 : vector<1x384xf32> to vector<8x384xf32>
    %14 = arith.addf %11, %13 : vector<8x384xf32>
    %15 = vector.extract_strided_slice %8 {offsets = [0, 0], sizes = [8, 32], strides = [1, 1]} : vector<8x384xf32> to vector<8x32xf32>
    %16 = vector.extract_strided_slice %14 {offsets = [0, 0], sizes = [8, 32], strides = [1, 1]} : vector<8x384xf32> to vector<8x32xf32>
    %17 = arith.addf %15, %16 : vector<8x32xf32>
    %18 = arith.negf %17 : vector<8x32xf32>
    %19 = math.exp %18 : vector<8x32xf32>
    %cst_10 = arith.constant 1.000000e+00 : f32
    %20 = vector.broadcast %cst_10 : f32 to vector<8x32xf32>
    %21 = arith.addf %20, %19 : vector<8x32xf32>
    %22 = arith.divf %20, %21 : vector<8x32xf32>
    %23 = vector.extract_strided_slice %8 {offsets = [0, 128], sizes = [8, 32], strides = [1, 1]} : vector<8x384xf32> to vector<8x32xf32>
    %24 = vector.extract_strided_slice %14 {offsets = [0, 128], sizes = [8, 32], strides = [1, 1]} : vector<8x384xf32> to vector<8x32xf32>
    %25 = arith.addf %23, %24 : vector<8x32xf32>
    %26 = arith.negf %25 : vector<8x32xf32>
    %27 = math.exp %26 : vector<8x32xf32>
    %cst_11 = arith.constant 1.000000e+00 : f32
    %28 = vector.broadcast %cst_11 : f32 to vector<8x32xf32>
    %29 = arith.addf %28, %27 : vector<8x32xf32>
    %30 = arith.divf %28, %29 : vector<8x32xf32>
    %31 = vector.extract_strided_slice %8 {offsets = [0, 256], sizes = [8, 32], strides = [1, 1]} : vector<8x384xf32> to vector<8x32xf32>
    %32 = vector.extract_strided_slice %14 {offsets = [0, 256], sizes = [8, 32], strides = [1, 1]} : vector<8x384xf32> to vector<8x32xf32>
    %33 = arith.mulf %22, %32 : vector<8x32xf32>
    %34 = arith.addf %31, %33 : vector<8x32xf32>
    %35 = math.tanh %34 : vector<8x32xf32>
    %cst_12 = arith.constant 1.000000e+00 : f32
    %36 = vector.broadcast %cst_12 : f32 to vector<8x32xf32>
    %37 = arith.subf %36, %30 : vector<8x32xf32>
    %38 = arith.mulf %37, %35 : vector<8x32xf32>
    %39 = arith.mulf %30, %0 : vector<8x32xf32>
    %40 = arith.addf %38, %39 : vector<8x32xf32>
    %c0_13 = arith.constant 0 : index
    %c0_14 = arith.constant 0 : index
    %41 = vector.load %arg5[%c0_13, %c0_14] : memref<8x32xf32, #tpu.memory_space<vmem>>, vector<8x32xf32>
    tpu.vector_store %arg5[%c0_13, %c0_14], %40 {strides = array<i32>} : memref<8x32xf32, #tpu.memory_space<vmem>>, vector<8x32xf32>,
    return
  }
}

</mosaic_0001>

<bundles_post_ra>
// kernel: gru_rnn_forward.1
= control target key start
LH: loop header
LB: loop body
LE: loop exit
PB: predicated region body
PF: predicated region fallthrough
CT: control target
= control target key end

     0   :  { %10 = vsyncpa [#allocation3], 0  ;;  %s661_s0 = inlined_call_operand.hbm [shape: f32[8,16], index: 0, kind: input, shape index: {}]   ;;  %s662_s1 = inlined_call_operand.hbm [shape: f32[8,32], index: 1, kind: input, shape index: {}]   ;;  %s663_s2 = inlined_call_operand.hbm [shape: bf16[16,384], index: 2, kind: input, shape index: {}]   ;;  %s664_s3 = inlined_call_operand.hbm [shape: bf16[32,384], index: 3, kind: input, shape index: {}]   ;;  %s665_s4 = inlined_call_operand.vmem [shape: f32[2,384], index: 4, kind: input, shape index: {}]   ;;  %s666_s5 = inlined_call_operand.vmem [shape: f32[8,32], index: 5, kind: output, shape index: {}]  }
   0x1   :  { %11 = vsyncpa [#allocation5], 0 }
   0x2   :  { %12 = vsyncpa [#allocation8], 0  ;;  %s558_s18 = smov [#allocation4]   ;;  %s559_s20 = smov [#allocation2]  }
   0x3   :  { %s29_s19 = sshll.u32 %s558_s18, 4  ;;  %s19_s21 = sshll.u32 %s559_s20, 4  ;;  %s30_s19 = int_to_ptr.vmem [resolvable:$true] %s29_s19  ;;  %s20_s21 = int_to_ptr.vmem [resolvable:$true] %s19_s21 }
   0x4   :  { %s464_s24 = scalar_lea.hbm %s662_s1, 128 }
   0x5   :  { %p465_p0 = scmp.ne.s32.totalorder %s662_s1, %s464_s24  ;;  %p468_p1 = scmp.lt.u32.totalorder %s464_s24, %s662_s1 }
   0x7   :  { %p470_p2 = pnand %p468_p1, %p465_p0 }
   0x9   :  { %473 = shalt.err (!%p470_p2)
}
   0xa   :  { %s474_s29 = scalar_lea.vmem %s30_s19, 128  ;;  %p479_p4 = scmp.lt.s32.totalorder %s30_s19, %s30_s19 }
   0xb   :  { %p475_p3 = scmp.ne.s32.totalorder %s30_s19, %s474_s29  ;;  %p480_p5 = scmp.lt.s32.totalorder %s474_s29, %s474_s29 }
   0xd   :  { %p481_p6 = por %p480_p5, %p479_p4 }
   0xf   :  { %p482_p7 = pnand %p481_p6, %p475_p3 }
  0x11   :  { %485 = shalt.err (!%p482_p7)
}
  0x12   :  { %32 = dma.hbm_to_vmem [thread:$0]  %s662_s1, 128, %s30_s19, [#allocation5]  }
  0x13   :  { %s486_s9 = scalar_lea.hbm %s661_s0, 128 }
  0x14   :  { %p487_p8 = scmp.ne.s32.totalorder %s661_s0, %s486_s9  ;;  %p490_p9 = scmp.lt.u32.totalorder %s486_s9, %s661_s0 }
  0x16   :  { %p492_p10 = pnand %p490_p9, %p487_p8 }
  0x18   :  { %495 = shalt.err (!%p492_p10)
}
  0x19   :  { %s496_s14 = scalar_lea.vmem %s20_s21, 128  ;;  %p501_p12 = scmp.lt.s32.totalorder %s20_s21, %s20_s21 }
  0x1a   :  { %p497_p11 = scmp.ne.s32.totalorder %s20_s21, %s496_s14  ;;  %p502_p13 = scmp.lt.s32.totalorder %s496_s14, %s496_s14 }
  0x1c   :  { %p503_p0 = por %p502_p13, %p501_p12 }
  0x1e   :  { %p504_p1 = pnand %p503_p0, %p497_p11 }
  0x20   :  { %507 = shalt.err (!%p504_p1)
}
  0x21   :  { %22 = dma.hbm_to_vmem [thread:$0]  %s661_s0, 128, %s20_s21, [#allocation3]  }
  0x22   :  { %s560_s16 = smov [#allocation6]   ;;  %s508_s20 = scalar_lea.hbm %s663_s2, 384 }
  0x23   :  { %s38_s17 = sshll.u32 %s560_s16, 4  ;;  %p509_p2 = scmp.ne.s32.totalorder %s663_s2, %s508_s20  ;;  %s39_s17 = int_to_ptr.vmem [resolvable:$true] %s38_s17 }
  0x24   :  { %p512_p3 = scmp.lt.u32.totalorder %s508_s20, %s663_s2 }
  0x26   :  { %p514_p4 = pnand %p512_p3, %p509_p2 }
  0x28   :  { %517 = shalt.err (!%p514_p4)
}
  0x29   :  { %s518_s26 = scalar_lea.vmem %s39_s17, 384  ;;  %p523_p6 = scmp.lt.s32.totalorder %s39_s17, %s39_s17 }
  0x2a   :  { %p519_p5 = scmp.ne.s32.totalorder %s39_s17, %s518_s26  ;;  %p524_p7 = scmp.lt.s32.totalorder %s518_s26, %s518_s26 }
  0x2c   :  { %p525_p8 = por %p524_p7, %p523_p6 }
  0x2e   :  { %p526_p9 = pnand %p525_p8, %p519_p5 }
  0x30   :  { %529 = shalt.err (!%p526_p9)
}
  0x31   :  { %s561_s0 = smov 192   ;;  %s562_s21 = smov 12  }
  0x32   :  { %44 = dma.hbm_to_vmem [thread:$0]  %s663_s2, 384, %s39_s17, [#allocation5], %s561_s0, %s561_s0, %s562_s21  }
  0x33   :  { %s563_s29 = smov [#allocation7]   ;;  %s530_s8 = scalar_lea.hbm %s664_s3, 768 }
  0x34   :  { %s50_s30 = sshll.u32 %s563_s29, 4  ;;  %p531_p10 = scmp.ne.s32.totalorder %s664_s3, %s530_s8  ;;  %s51_s30 = int_to_ptr.vmem [resolvable:$true] %s50_s30 }
  0x35   :  { %p534_p11 = scmp.lt.u32.totalorder %s530_s8, %s664_s3 }
  0x37   :  { %p536_p12 = pnand %p534_p11, %p531_p10 }
  0x39   :  { %539 = shalt.err (!%p536_p12)
}
  0x3a   :  { %s540_s13 = scalar_lea.vmem %s51_s30, 768  ;;  %p545_p0 = scmp.lt.s32.totalorder %s51_s30, %s51_s30 }
  0x3b   :  { %p541_p13 = scmp.ne.s32.totalorder %s51_s30, %s540_s13  ;;  %p546_p1 = scmp.lt.s32.totalorder %s540_s13, %s540_s13 }
  0x3d   :  { %p547_p2 = por %p546_p1, %p545_p0 }
  0x3f   :  { %p548_p3 = pnand %p547_p2, %p541_p13 }
  0x41   :  { %551 = shalt.err (!%p548_p3)
}
  0x42   :  { %56 = dma.hbm_to_vmem [thread:$0]  %s664_s3, 768, %s51_s30, [#allocation8], %s561_s0, %s561_s0, %s562_s21  }
  0x43   :  { %552 = dma.done.wait [#allocation3], 128  }
  0x44   :  { %553 = vsyncadd [#allocation3], 4294967168 }
  0x45   :  { %554 = dma.done.wait [#allocation5], 512  }
  0x46   :  { %555 = vsyncadd [#allocation5], 4294966784 }
  0x47   :  { %556 = dma.done.wait [#allocation8], 768  }
  0x48   :  { %557 = vsyncadd [#allocation8], 4294966528  ;;  %v564_v0 = vmov 0   ;;  %v565_v1 = vmov 0.0   ;;  %vm566_vm0 = vmmov 0   ;;  %v74_v4 = vld [vmem:[#allocation2] sm:$0xff]  ;;  %v81_v15 = vlaneseq }
  0x49   :  { %160 = vmatprep.mubr.bf16.mxu0 %v564_v0  ;;  %411 = vmatprep.subr.bf16.mxu1 %v565_v1  ;;  %v442_v2 = vld [vmem:[#allocation6 + $0x4] ss:$12 sps:$4 sm:$0xff]   ;;  %v444_v3 = vld [vmem:[#allocation6] ss:$12 sps:$4 sm:$0xff]   ;;  %v75_v5 = vpack.c.bf16 %v74_v4, %v74_v4  ;;  %v447_v6 = vld [vmem:[#allocation7 + $0x4] ss:$12 sps:$4 sm:$0xff]  }
  0x4a   :  { %413 = vmatprep.mubr.msk.bf16.mxu1 %vm566_vm0, %v565_v1  ;;  %128 = vmatprep.subr.bf16.mxu0 %v442_v2  ;;  %vm124_vm1 = vcmask 130048   ;;  %v445_v7 = vld [vmem:[#allocation7] ss:$12 sps:$4 sm:$0xff]   ;;  %v450_v8 = vld [vmem:[#allocation7 + $0x1c] ss:$12 sps:$4 sm:$0xff]   ;;  %vm277_vm2 = vcmask 261120  }
  0x4b   :  { %129 = vmatpush1.bf16.msra.mxu0 %v444_v3  ;;  %v451_v9 = vld [vmem:[#allocation6 + $0x8] ss:$12 sps:$4 sm:$0xff]   ;;  %v448_v10 = vld [vmem:[#allocation7 + $0x18] ss:$12 sps:$4 sm:$0xff]   ;;  %v452_v11 = vld [vmem:[#allocation7 + $0x8] ss:$12 sps:$4 sm:$0xff]  }
  0x4c   :  { %281 = vmatprep.subr.bf16.mxu0 %v447_v6  ;;  %412 = vmatpush3.bf16.msra.mxu1 %v451_v9  ;;  %v646_v12 = vld [vmem:[#allocation4] sm:$0xff]  ;;  %v82_v16 = vshrl.u32 %v81_v15, 7  ;;  %v73_v19 = vld [vmem:[%s665_s4] sm:$0x3f] }
  0x4d   :  { %417 = vmatprep.subr.bf16.mxu1 %v565_v1  ;;  %v453_v13 = vld [vmem:[#allocation7 + $0x20] ss:$12 sps:$4 sm:$0xff]   ;;  %v209_v14 = vpack.c.bf16 %v646_v12, %v646_v12 }
  0x4e   :  { %394 = vmatmul.mubr.msk.bf16.vlgmr.msra.gmra.mrb[0].mxu0 %vm124_vm1, %v75_v5  ;;  %v83_v17 = vsub.s32 0, %v82_v16  ;;  %v220_v18 = vsub.s32 1, %v82_v16  ;;  %v87_v20 = vsub.s32 2, %v82_v16  ;;  %v224_v21 = vsub.s32 3, %v82_v16 }
  0x4f   :  { %282 = vmatpush1.bf16.msra.mxu0 %v445_v7  ;;  %313 = vmatprep.mubr.bf16.mxu0 %v564_v0  ;;  %v228_v48 = vsub.s32 5, %v82_v16  ;;  %v91_v51 = vsub.s32 4, %v82_v16 }
  0x50   :  { %283 = vmatprep.subr.bf16.mxu0 %v450_v8  ;;  %414 = vmatmul.mubr.msk.bf16.vlgmr.msra.gmra.mrb[0].mxu1 %vm124_vm1, %v75_v5  ;;  %v84_v22 = vrot.slane %v73_v19, %v83_v17  ;;  %v221_v23 = vrot.slane %v73_v19, %v220_v18  ;;  %v88_v24 = vrot.slane %v73_v19, %v87_v20 }
  0x51   :  { %418 = vmatpush3.bf16.msra.mxu1 %v452_v11  ;;  %421 = vmatprep.mubr.msk.bf16.mxu1 %vm566_vm0, %v565_v1  ;;  %v225_v25 = vrot.slane %v73_v19, %v224_v21  ;;  %v229_v52 = vrot.slane %v73_v19, %v228_v48  ;;  %v92_v53 = vrot.slane %v73_v19, %v91_v51 }
  0x52   :  { %419 = vmatprep.subr.bf16.mxu1 %v565_v1  ;;  %v99_v26 = vrot.slane %v84_v22, %v83_v17  ;;  %v236_v27 = vrot.slane %v221_v23, %v220_v18  ;;  %v103_v31 = vrot.slane %v88_v24, %v83_v17 }
  0x53   :  { %284 = vmatpush1.bf16.msra.mxu0 %v448_v10  ;;  %v240_v32 = vrot.slane %v225_v25, %v220_v18  ;;  %v244_v54 = vrot.slane %v229_v52, %v220_v18  ;;  %v107_v57 = vrot.slane %v92_v53, %v83_v17 }
  0x54   :  { %v425_v34 = vadd.f32 %v236_v27, %v99_v26 }
  0x55   :  { %420 = vmatpush3.bf16.msra.mxu1 %v453_v13  ;;  %v427_v36 = vadd.f32 %v240_v32, %v103_v31 }
  0x58   :  { %422 = vmatmul.mubr.msk.bf16.vlgmr.msra.gmra.mrb[4].mxu1 %vm277_vm2, %v209_v14 }
  0x5a   :  { %402 = vmatmul.mubr.msk.bf16.vlgmr.msra.gmra.mrb[0].mxu0 %vm277_vm2, %v209_v14 }
 0x123   :  { %v203_v28 = vpop.f32.mrb[0].mxu1 }
 0x124   :  { %v415_v29 = vpop.f32.mrb[1].mxu1  ;;  %v204_v60 = vadd.f32 %v203_v28, %v107_v57 }
 0x125   :  { %v206_v30 = vpop.f32.mrb[2].mxu1 }
 0x126   :  { %v416_v33 = vpop.f32.mrb[3].mxu1 }
 0x12b   :  { %v356_v39 = vpop.f32.mrb[4].mxu1 }
 0x12c   :  { %v423_v41 = vpop.f32.mrb[5].mxu1  ;;  %v357_v58 = vadd.f32 %v356_v39, %v244_v54 }
 0x12d   :  { %v315_v35 = vpop.f32.mrb[0].mxu0  ;;  %v359_v44 = vpop.f32.mrb[6].mxu1 }
 0x12e   :  { %v426_v37 = vadd.f32 %v425_v34, %v315_v35  ;;  %v317_v38 = vpop.f32.mrb[1].mxu0  ;;  %v424_v46 = vpop.f32.mrb[7].mxu1 }
 0x12f   :  { %v319_v40 = vpop.f32.mrb[2].mxu0  ;;  %v428_v45 = vadd.f32 %v427_v36, %v317_v38 }
 0x130   :  { %v404_v42 = vmul.f32 -1.442695, %v426_v37  ;;  %v320_v43 = vpop.f32.mrb[3].mxu0 }
 0x131   :  { %v405_v47 = vmul.f32 -1.442695, %v428_v45 }
 0x132   :  { %454 = vpow2.f32 %v404_v42 }
 0x133   :  { %456 = vpow2.f32 %v405_v47 }
 0x13c   :  { %v455_v49 = vpop.eup %454 }
 0x13d   :  { %v366_v50 = vadd.f32 1.0, %v455_v49  ;;  %v457_v55 = vpop.eup %456 }
 0x13e   :  { %v373_v56 = vadd.f32 1.0, %v457_v55 }
 0x13f   :  { %458 = vrcp.f32 %v366_v50 }
 0x140   :  { %460 = vrcp.f32 %v373_v56 }
 0x149   :  { %v459_v59 = vpop.eup %458 }
 0x14a   :  { %v376_v61 = vmul.f32 %v459_v59, %v357_v58  ;;  %v461_v63 = vpop.eup %460 }
 0x14b   :  { %v379_v0 = vsub.f32 1.0, %v461_v63  ;;  %v381_v2 = vmul.f32 %v461_v63, %v646_v12 }
 0x14c   :  { %v377_v62 = vadd.f32 %v376_v61, %v204_v60 }
 0x14e   :  { %462 = vtanh.f32 %v377_v62 }
 0x158   :  { %v463_v1 = vpop.eup %462 }
 0x159   :  { %v380_v3 = vmul.f32 %v463_v1, %v379_v0 }
 0x15b   :  { %v382_v4 = vadd.f32 %v381_v2, %v380_v3 }
 0x15d   :  { %383 = vst.msk [vmem:[%s666_s5] sm:$0xff] %vm277_vm2, %v382_v4 }
 0x15e   :  { %388 = vsyncpa [#allocation3], 1 }
 0x15f   :  { %389 = vsyncpa [#allocation5], 1 }
 0x160   :  { %390 = vsyncpa [#allocation8], 1 }

</bundles_post_ra>
